<compile_context>
chip_gen: v7x
topology: tpu7x:2x2x1
jax: 0.10.0
libtpu: 0.0.40
codegen_flags: <defaults>
</compile_context>

<pallas_src>
import jax
import jax.numpy as jnp
from jax.experimental import pallas as pl
from jax.experimental.pallas import tpu as pltpu

_LANE = 128
# Per-block VMEM budget. With 2 inputs + 1 output, double-buffered, a 4 MiB
# block uses ~24 MiB of VMEM, which fits every generation (v7x included).
_TILE_BYTES = 4 * 1024 * 1024
_VMEM_LIMIT = 48 * 1024 * 1024
# Prefer wide lane-dense blocks (large multiple of 128) -> unmasked vst.
_PREF_COLS = 16384


def _abs_diff_kernel(a_ref, b_ref, o_ref):
    # Elementwise hot path: L1 (absolute) difference on the current VMEM block.
    o_ref[...] = jnp.abs(a_ref[...] - b_ref[...])


def _sublane_pack(dtype):
    # Sub-32-bit dtypes pack along sublanes: f32 -> 8, bf16 -> 16, int8 -> 32.
    return max(8, 32 // jnp.dtype(dtype).itemsize)


def _largest_divisor(n, cap, multiple_of=1):
    cap = min(cap, n)
    for d in range(cap, 0, -1):
        if n % d == 0 and d % multiple_of == 0:
            return d
    return None


def _choose_layout(total, itemsize, sublane):
    """Pick (rows, cols, tile_rows) such that:
       cols % 128 == 0, cols divides total (no padding),
       tile_rows divides rows, block (tile_rows, cols) fits _TILE_BYTES,
       and tile_rows is a sublane multiple or equals rows.
       Returns None if no such layout exists (fallback path then pads)."""
    if total % _LANE:
        return None
    q = total // _LANE
    # Widest lane dim first (lane-dense out_spec is the biggest single lever),
    # but a single block row must still fit the byte budget.
    max_k = min(q, _TILE_BYTES // (_LANE * itemsize))
    pref_k = min(max_k, _PREF_COLS // _LANE)
    for k in range(pref_k, 0, -1):
        if q % k:
            continue
        cols = _LANE * k
        rows = total // cols
        cap_rows = max(1, _TILE_BYTES // (cols * itemsize))
        if rows <= cap_rows:
            return rows, cols, rows          # whole array in a single block
        tile_rows = _largest_divisor(rows, cap_rows, multiple_of=sublane)
        if tile_rows is not None:
            return rows, cols, tile_rows
    return None


def _run_2d(a2, b2, tile_rows, cols):
    rows = a2.shape[0]
    grid = (rows // tile_rows,)
    spec = pl.BlockSpec((tile_rows, cols), lambda i: (i, 0))
    return pl.pallas_call(
        _abs_diff_kernel,
        out_shape=jax.ShapeDtypeStruct((rows, cols), a2.dtype),
        grid=grid,
        in_specs=[spec, spec],
        out_specs=spec,
        compiler_params=pltpu.CompilerParams(
            dimension_semantics=("parallel",),
            vmem_limit_bytes=_VMEM_LIMIT,
        ),
    )(a2, b2)


def joint_heatmap_loss(joint_out, joint_gt):
    """Computes torch.abs(joint_out - joint_gt) with a Pallas TPU kernel.

    joint_out / joint_gt: same shape, e.g. (B, J, H, W) NCHW heatmaps.
    Returns an array of the same shape/dtype (elementwise absolute difference).
    """
    assert joint_out.shape == joint_gt.shape, "shapes must match"
    assert joint_out.dtype == joint_gt.dtype, "dtypes must match"
    shape = joint_out.shape
    dtype = joint_out.dtype
    itemsize = jnp.dtype(dtype).itemsize
    sublane = _sublane_pack(dtype)

    total = 1
    for s in shape:
        total *= s

    a = joint_out.reshape(total)
    b = joint_gt.reshape(total)

    # Fast path: lane-dense layout with no padding and no output re-slice.
    layout = _choose_layout(total, itemsize, sublane)
    if layout is not None:
        rows, cols, tile_rows = layout
        out2 = _run_2d(a.reshape(rows, cols), b.reshape(rows, cols),
                       tile_rows, cols)
        return out2.reshape(shape)

    # Rare fallback: pad the flat array to a (sublane * 1024)-element multiple
    # so the (rows, 1024) view tiles cleanly, then slice the pad off.
    cols = 8 * _LANE
    pad_to = sublane * cols
    padded = ((total + pad_to - 1) // pad_to) * pad_to
    pad = padded - total
    a = jnp.pad(a, (0, pad))
    b = jnp.pad(b, (0, pad))
    rows = padded // cols
    cap_rows = max(1, _TILE_BYTES // (cols * itemsize))
    if rows <= cap_rows:
        tile_rows = rows
    else:
        tile_rows = _largest_divisor(rows, cap_rows, multiple_of=sublane)
    out2 = _run_2d(a.reshape(rows, cols), b.reshape(rows, cols),
                   tile_rows, cols)
    out = out2.reshape(padded)
    if pad:
        out = out[:total]
    return out.reshape(shape)


if __name__ == "__main__":
    key = jax.random.PRNGKey(0)
    k1, k2 = jax.random.split(key)

    # Small NCHW heatmap shapes: batch=2, joints=4, spatial=16x16.
    shape = (2, 4, 16, 16)
    joint_out = jax.random.normal(k1, shape, dtype=jnp.float32)
    joint_gt = jax.random.normal(k2, shape, dtype=jnp.float32)

    loss = joint_heatmap_loss(joint_out, joint_gt)
    loss = jax.block_until_ready(loss)

    # Correctness check against plain JAX reference.
    ref = jnp.abs(joint_out - joint_gt)
    assert loss.shape == shape
    assert loss.dtype == joint_out.dtype
    assert jnp.allclose(loss, ref, atol=1e-6), "mismatch vs reference"

    print("KERNEL_OK")
</pallas_src>

<mosaic_0001>
module attributes {stable_mosaic.version = 11 : i64} {
  func.func @_abs_diff_kernel(%arg0: i32, %arg1: memref<1x2048xf32, #tpu.memory_space<vmem>>, %arg2: memref<1x2048xf32, #tpu.memory_space<vmem>>, %arg3: memref<1x2048xf32, #tpu.memory_space<vmem>>) attributes {dimension_semantics = [#tpu.dimension_semantics<parallel>], iteration_bounds = array<i64: 1>, scalar_prefetch = 0 : i64, scratch_operands = 0 : i64, tpu.core_type = #tpu.core_type<tc>, window_params = [{transform_indices = @transform_0, window_bounds = array<i64: 1, 2048>}, {transform_indices = @transform_1, window_bounds = array<i64: 1, 2048>}, {transform_indices = @transform_2, window_bounds = array<i64: 1, 2048>}]} {
    %c0 = arith.constant 0 : index
    %c0_0 = arith.constant 0 : index
    %0 = vector.load %arg1[%c0, %c0_0] : memref<1x2048xf32, #tpu.memory_space<vmem>>, vector<1x2048xf32>
    %c0_1 = arith.constant 0 : index
    %c0_2 = arith.constant 0 : index
    %1 = vector.load %arg2[%c0_1, %c0_2] : memref<1x2048xf32, #tpu.memory_space<vmem>>, vector<1x2048xf32>
    %2 = arith.subf %0, %1 : vector<1x2048xf32>
    %3 = math.absf %2 : vector<1x2048xf32>
    %c0_3 = arith.constant 0 : index
    %c0_4 = arith.constant 0 : index
    %4 = vector.load %arg3[%c0_3, %c0_4] : memref<1x2048xf32, #tpu.memory_space<vmem>>, vector<1x2048xf32>
    tpu.vector_store %arg3[%c0_3, %c0_4], %3 {strides = array<i32>} : memref<1x2048xf32, #tpu.memory_space<vmem>>, vector<1x2048xf32>,
    return
  }
  func.func @transform_0(%arg0: i32) -> (i32, i32) {
    %c0_i32 = arith.constant 0 : i32
    %c0_i32_0 = arith.constant 0 : i32
    return %arg0, %c0_i32 : i32, i32
  }
  func.func @transform_1(%arg0: i32) -> (i32, i32) {
    %c0_i32 = arith.constant 0 : i32
    %c0_i32_0 = arith.constant 0 : i32
    return %arg0, %c0_i32 : i32, i32
  }
  func.func @transform_2(%arg0: i32) -> (i32, i32) {
    %c0_i32 = arith.constant 0 : i32
    %c0_i32_0 = arith.constant 0 : i32
    return %arg0, %c0_i32 : i32, i32
  }
}

</mosaic_0001>

<bundles_post_ra>
// kernel: tpu_custom_call.1
= control target key start
LH: loop header
LB: loop body
LE: loop exit
PB: predicated region body
PF: predicated region fallthrough
CT: control target
= control target key end

     0   :  { %7 = vsyncpa [#allocation3], 0  ;;  %s191_s0 = inlined_call_operand.hbm [shape: f32[1,2048], index: 0, kind: input, shape index: {}]   ;;  %s192_s1 = inlined_call_operand.hbm [shape: f32[1,2048], index: 1, kind: input, shape index: {}]   ;;  %s193_s2 = inlined_call_operand.hbm [shape: f32[1,2048], index: 2, kind: output, shape index: {}]  }
   0x1   :  { %8 = vsyncpa [#allocation6], 0 }
   0x2   :  { %9 = vsyncpa [#allocation4], 0  ;;  %s137_s9 = smov [#allocation2]   ;;  %s138_s11 = smov [#allocation5]  }
   0x3   :  { %s16_s10 = sshll.u32 %s137_s9, 4  ;;  %s26_s12 = sshll.u32 %s138_s11, 4  ;;  %s17_s10 = int_to_ptr.vmem [resolvable:$true] %s16_s10  ;;  %s27_s12 = int_to_ptr.vmem [resolvable:$true] %s26_s12 }
   0x4   :  { %s65_s15 = scalar_lea.hbm %s191_s0, 256 }
   0x5   :  { %p66_p0 = scmp.ne.s32.totalorder %s191_s0, %s65_s15  ;;  %p69_p1 = scmp.lt.u32.totalorder %s65_s15, %s191_s0 }
   0x7   :  { %p71_p2 = pnand %p69_p1, %p66_p0 }
   0x9   :  { %74 = shalt.err (!%p71_p2)
}
   0xa   :  { %s75_s20 = scalar_lea.vmem %s17_s10, 256  ;;  %p80_p4 = scmp.lt.s32.totalorder %s17_s10, %s17_s10 }
   0xb   :  { %p76_p3 = scmp.ne.s32.totalorder %s17_s10, %s75_s20  ;;  %p81_p5 = scmp.lt.s32.totalorder %s75_s20, %s75_s20 }
   0xd   :  { %p82_p6 = por %p81_p5, %p80_p4 }
   0xf   :  { %p83_p7 = pnand %p82_p6, %p76_p3 }
  0x11   :  { %86 = shalt.err (!%p83_p7)
}
  0x12   :  { %19 = dma.hbm_to_vmem [thread:$0]  %s191_s0, 256, %s17_s10, [#allocation3]  }
  0x13   :  { %s87_s25 = scalar_lea.hbm %s192_s1, 256 }
  0x14   :  { %p88_p8 = scmp.ne.s32.totalorder %s192_s1, %s87_s25  ;;  %p91_p9 = scmp.lt.u32.totalorder %s87_s25, %s192_s1 }
  0x16   :  { %p93_p10 = pnand %p91_p9, %p88_p8 }
  0x18   :  { %96 = shalt.err (!%p93_p10)
}
  0x19   :  { %s97_s30 = scalar_lea.vmem %s27_s12, 256  ;;  %p102_p12 = scmp.lt.s32.totalorder %s27_s12, %s27_s12 }
  0x1a   :  { %p98_p11 = scmp.ne.s32.totalorder %s27_s12, %s97_s30  ;;  %p103_p13 = scmp.lt.s32.totalorder %s97_s30, %s97_s30 }
  0x1c   :  { %p104_p0 = por %p103_p13, %p102_p12 }
  0x1e   :  { %p105_p1 = pnand %p104_p0, %p98_p11 }
  0x20   :  { %108 = shalt.err (!%p105_p1)
}
  0x21   :  { %29 = dma.hbm_to_vmem [thread:$0]  %s192_s1, 256, %s27_s12, [#allocation6]  }
  0x22   :  { %131 = dma.done.wait [#allocation3], 256  }
  0x23   :  { %132 = vsyncadd [#allocation3], 4294967040 }
  0x24   :  { %133 = dma.done.wait [#allocation6], 256  }
  0x25   :  { %134 = vsyncadd [#allocation6], 4294967040  ;;  %v36_v0 = vld [vmem:[#allocation2] sm:$0xff]  ;;  %v38_v1 = vld [vmem:[#allocation5] sm:$0xff]  ;;  %s139_s4 = smov [#allocation7]  }
  0x26   :  { %v37_v2 = vld [vmem:[#allocation2 + $0x8] sm:$0xff]  ;;  %v40_v3 = vsub.f32 %v36_v0, %v38_v1  ;;  %v39_v4 = vld [vmem:[#allocation5 + $0x8] sm:$0xff]  ;;  %s52_s5 = sshll.u32 %s139_s4, 4  ;;  %s53_s5 = int_to_ptr.vmem [resolvable:$true] %s52_s5 }
  0x27   :  { %v41_v5 = vsub.f32 %v37_v2, %v39_v4  ;;  %s109_s6 = scalar_lea.vmem %s53_s5, 256  ;;  %p114_p3 = scmp.lt.s32.totalorder %s53_s5, %s53_s5 }
  0x28   :  { %v42_v6 = vand.u32 2147483647, %v40_v3  ;;  %p110_p2 = scmp.ne.s32.totalorder %s53_s5, %s109_s6  ;;  %p115_p4 = scmp.lt.s32.totalorder %s109_s6, %s109_s6 }
  0x29   :  { %v43_v7 = vand.u32 2147483647, %v41_v5 }
  0x2a   :  { %44 = vst [vmem:[#allocation7] sm:$0xff] %v42_v6  ;;  %p116_p5 = por %p115_p4, %p114_p3 }
  0x2b   :  { %45 = vst [vmem:[#allocation7 + $0x8] sm:$0xff] %v43_v7 }
  0x2c   :  { %p117_p6 = pnand %p116_p5, %p110_p2 }
  0x2e   :  { %120 = shalt.err (!%p117_p6)
}
  0x2f   :  { %s121_s8 = scalar_lea.hbm %s193_s2, 256 }
  0x30   :  { %p122_p7 = scmp.ne.s32.totalorder %s193_s2, %s121_s8  ;;  %p125_p8 = scmp.lt.u32.totalorder %s121_s8, %s193_s2 }
  0x32   :  { %p127_p9 = pnand %p125_p8, %p122_p7 }
  0x34   :  { %130 = shalt.err (!%p127_p9)
}
  0x35   :  { %55 = dma.vmem_to_hbm [thread:$0]  %s53_s5, 256, %s193_s2, [#allocation4]  }
  0x36   :  { %135 = dma.done.wait [#allocation4], 256  }
  0x37   :  { %136 = vsyncadd [#allocation4], 4294967040 }
  0x38   :  { %59 = vsyncpa [#allocation3], 1 }
  0x39   :  { %60 = vsyncpa [#allocation6], 1 }
  0x3a   :  { %61 = vsyncpa [#allocation4], 1 }

</bundles_post_ra>
